<compile_context>
chip_gen: v7x
topology: tpu7x:2x2x1
jax: 0.10.0
libtpu: 0.0.40
codegen_flags: <defaults>
</compile_context>

<pallas_src>
import functools

import jax
import jax.numpy as jnp
from jax.experimental import pallas as pl
from jax.experimental.pallas import tpu as pltpu

_LANE = 128
_SUBLANE = 8


def _round_up(a, m):
    return (a + m - 1) // m * m


def _pick_divisor_tile(dim_aligned, target):
    """Largest multiple of 128 <= min(target, dim_aligned) dividing dim_aligned.

    dim_aligned is already a multiple of 128, so 128 always works -> zero padding
    waste along that dimension.
    """
    t = min(target, dim_aligned)
    t = max(_LANE, (t // _LANE) * _LANE)
    while dim_aligned % t != 0:
        t -= _LANE
    return t


# ----------------------------- kernels -----------------------------

def _linear_kernel_out_acc(x_ref, w_ref, b_ref, o_ref):
    """f32 output: accumulate directly into the VMEM-resident output block."""
    k = pl.program_id(2)
    prod = jnp.dot(x_ref[...], w_ref[...], preferred_element_type=jnp.float32)

    @pl.when(k == 0)
    def _():
        # Bias folded into the first K step (no separate init + RMW).
        o_ref[...] = b_ref[...] + prod

    @pl.when(k > 0)
    def _():
        o_ref[...] += prod


def _linear_kernel_scratch_acc(x_ref, w_ref, b_ref, o_ref, acc_ref):
    """Narrow output dtype: f32 scratch accumulator, cast on the last K step."""
    k = pl.program_id(2)
    prod = jnp.dot(x_ref[...], w_ref[...], preferred_element_type=jnp.float32)

    @pl.when(k == 0)
    def _():
        acc_ref[...] = b_ref[...] + prod

    @pl.when(k > 0)
    def _():
        acc_ref[...] += prod

    @pl.when(k == pl.num_programs(2) - 1)
    def _():
        o_ref[...] = acc_ref[...].astype(o_ref.dtype)


@functools.lru_cache(maxsize=64)
def _build_call(Bp, Kp, Np, tm, tn, tk, out_dtype_name):
    out_dtype = jnp.dtype(out_dtype_name)
    grid = (Bp // tm, Np // tn, Kp // tk)

    in_specs = [
        pl.BlockSpec((tm, tk), lambda i, j, k: (i, k)),   # x tile (bf16)
        pl.BlockSpec((tk, tn), lambda i, j, k: (k, j)),   # W^T tile (bf16)
        pl.BlockSpec((1, tn), lambda i, j, k: (0, j)),    # bias tile (f32)
    ]
    out_spec = pl.BlockSpec((tm, tn), lambda i, j, k: (i, j))

    if out_dtype == jnp.float32:
        kernel, scratch = _linear_kernel_out_acc, []
    else:
        kernel, scratch = _linear_kernel_scratch_acc, [pltpu.VMEM((tm, tn), jnp.float32)]

    return pl.pallas_call(
        kernel,
        out_shape=jax.ShapeDtypeStruct((Bp, Np), out_dtype),
        grid=grid,
        in_specs=in_specs,
        out_specs=out_spec,
        scratch_shapes=scratch,
        compiler_params=pltpu.CompilerParams(
            dimension_semantics=("parallel", "parallel", "arbitrary"),
            vmem_limit_bytes=48 * 1024 * 1024,  # hard ceiling safe on v7x (64 MiB/TC)
        ),
    )


# ----------------------------- wrapper -----------------------------

class ModeloLinearPallas:
    """Pallas TPU forward for torch.nn.Linear: y = x @ W^T + b.

    The PyTorch-layout weight (n_out, n_in) is transposed, cast to the MXU compute
    dtype (bf16 by default) and padded ONCE at construction time, so per-call work
    is only: cast/pad x, one pallas_call, optional slice.
    """

    def __init__(self, weight, bias, *, compute_dtype=jnp.bfloat16,
                 tm_max=512, tn_max=512, tk_max=512, small_batch_rows=1024):
        n_out, n_in = weight.shape
        self.n_in, self.n_out = int(n_in), int(n_out)
        self.compute_dtype = compute_dtype
        self.tm_max = tm_max
        self.small_batch_rows = small_batch_rows

        Kp = _round_up(self.n_in, _LANE)
        Np = _round_up(self.n_out, _LANE)
        tk = _pick_divisor_tile(Kp, tk_max)
        tn = _pick_divisor_tile(Np, tn_max)
        if Np // tn == 1 and Np >= 2 * _LANE:
            # Ensure >=2 blocks along the parallel N axis: keeps both v7x TensorCores
            # busy even when the M grid is a single block (small-batch path).
            tn = _pick_divisor_tile(Np, Np // 2)
        self.Kp, self.Np, self.tk, self.tn = Kp, Np, tk, tn

        # Hoisted weight prep: transpose -> cast -> pad, exactly once.
        w_t = jnp.asarray(weight).T.astype(compute_dtype)          # (n_in, n_out)
        if (Kp, Np) != (self.n_in, self.n_out):
            w_t = jnp.pad(w_t, ((0, Kp - self.n_in), (0, Np - self.n_out)))
        self.w_t = w_t

        b = jnp.asarray(bias, jnp.float32).reshape(1, self.n_out)  # exact f32 bias add
        if Np != self.n_out:
            b = jnp.pad(b, ((0, 0), (0, Np - self.n_out)))
        self.bias = b

    def __call__(self, x):
        B, n_in = x.shape
        assert n_in == self.n_in, f"expected n_in={self.n_in}, got {n_in}"
        out_dtype = jnp.dtype(x.dtype)

        Bp8 = _round_up(B, _SUBLANE)
        if Bp8 <= self.small_batch_rows:
            # Full batch resident -> the weight streams from HBM exactly once.
            tm, Bp = Bp8, Bp8
        else:
            tm = self.tm_max
            Bp = _round_up(B, tm)

        xc = x.astype(self.compute_dtype)
        if (Bp, self.Kp) != (B, n_in):
            xc = jnp.pad(xc, ((0, Bp - B), (0, self.Kp - n_in)))

        call = _build_call(Bp, self.Kp, self.Np, tm, self.tn, self.tk, out_dtype.name)
        out = call(xc, self.w_t, self.bias)

        if (Bp, self.Np) != (B, self.n_out):
            out = out[:B, :self.n_out]
        return out


def modelo_linear_forward(x, weight, bias, **kwargs):
    """One-shot convenience wrapper (weight prep is NOT cached across calls)."""
    return ModeloLinearPallas(weight, bias, **kwargs)(x)


# ----------------------------- self-test -----------------------------

if __name__ == "__main__":
    key = jax.random.PRNGKey(0)

    def make_case(k, batch, n_inputs, n_outputs):
        kx, kw, kb = jax.random.split(k, 3)
        bound = 1.0 / (n_inputs ** 0.5)  # torch.nn.Linear default init range
        weight = jax.random.uniform(kw, (n_outputs, n_inputs), jnp.float32,
                                    minval=-bound, maxval=bound)
        bias = jax.random.uniform(kb, (n_outputs,), jnp.float32,
                                  minval=-bound, maxval=bound)
        x = jax.random.normal(kx, (batch, n_inputs), jnp.float32)
        return x, weight, bias

    # Case 1: small shapes consistent with the module (batch=8, n_inputs=32, n_outputs=16).
    k1, k2 = jax.random.split(key)
    x, w, b = make_case(k1, 8, 32, 16)
    layer = ModeloLinearPallas(w, b)
    out = jax.block_until_ready(layer(x))
    ref = x @ w.T + b
    assert out.shape == (8, 16)
    # bf16 MXU operands, f32 accumulation -> loosened tolerance vs f32 reference.
    assert jnp.allclose(out, ref, atol=2e-2, rtol=2e-2), float(jnp.max(jnp.abs(out - ref)))

    # Case 2: non-tile-multiple shapes exercising the tiled grid, small-batch path,
    # N-split (>=2 parallel blocks) and padding/slicing path.
    x2, w2, b2 = make_case(k2, 300, 700, 384)
    layer2 = ModeloLinearPallas(w2, b2)
    out2 = jax.block_until_ready(layer2(x2))
    ref2 = x2 @ w2.T + b2
    assert out2.shape == (300, 384)
    assert jnp.allclose(out2, ref2, atol=5e-2, rtol=2e-2), float(jnp.max(jnp.abs(out2 - ref2)))

    print("KERNEL_OK")
</pallas_src>

<mosaic_0001>
module attributes {stable_mosaic.version = 11 : i64} {
  func.func @_linear_kernel_out_acc(%arg0: i32, %arg1: i32, %arg2: i32, %arg3: memref<8x128xbf16, #tpu.memory_space<vmem>>, %arg4: memref<128x128xbf16, #tpu.memory_space<vmem>>, %arg5: memref<1x128xf32, #tpu.memory_space<vmem>>, %arg6: memref<8x128xf32, #tpu.memory_space<vmem>>) attributes {dimension_semantics = [#tpu.dimension_semantics<parallel>, #tpu.dimension_semantics<parallel>, #tpu.dimension_semantics<arbitrary>], iteration_bounds = array<i64: 1, 1, 1>, scalar_prefetch = 0 : i64, scratch_operands = 0 : i64, tpu.core_type = #tpu.core_type<tc>, window_params = [{transform_indices = @transform_0, window_bounds = array<i64: 8, 128>}, {transform_indices = @transform_1, window_bounds = array<i64: 128, 128>}, {transform_indices = @transform_2, window_bounds = array<i64: 1, 128>}, {transform_indices = @transform_3, window_bounds = array<i64: 8, 128>}]} {
    %c0 = arith.constant 0 : index
    %c0_0 = arith.constant 0 : index
    %0 = vector.load %arg3[%c0, %c0_0] : memref<8x128xbf16, #tpu.memory_space<vmem>>, vector<8x128xbf16>
    %c0_1 = arith.constant 0 : index
    %c0_2 = arith.constant 0 : index
    %1 = vector.load %arg4[%c0_1, %c0_2] : memref<128x128xbf16, #tpu.memory_space<vmem>>, vector<128x128xbf16>
    %cst = arith.constant dense<0.000000e+00> : vector<8x128xf32>
    %2 = tpu.matmul %0, %1, %cst {dimension_numbers = #tpu.dot_dimension_numbers<[1], [0], [0], [1], [0, 0, 1, 1], [], []>} : vector<8x128xbf16>, vector<128x128xbf16>, vector<8x128xf32> -> vector<8x128xf32>
    %c0_i32 = arith.constant 0 : i32
    %3 = arith.cmpi eq, %arg2, %c0_i32 : i32
    %4 = arith.extui %3 : i1 to i32
    %c0_i32_3 = arith.constant 0 : i32
    %5 = arith.cmpi ne, %4, %c0_i32_3 : i32
    scf.if %5 {
      %c0_6 = arith.constant 0 : index
      %c0_7 = arith.constant 0 : index
      %9 = vector.load %arg5[%c0_6, %c0_7] : memref<1x128xf32, #tpu.memory_space<vmem>>, vector<1x128xf32>
      %10 = vector.broadcast %9 : vector<1x128xf32> to vector<8x128xf32>
      %11 = arith.addf %10, %2 : vector<8x128xf32>
      %c0_8 = arith.constant 0 : index
      %c0_9 = arith.constant 0 : index
      %12 = vector.load %arg6[%c0_8, %c0_9] : memref<8x128xf32, #tpu.memory_space<vmem>>, vector<8x128xf32>
      tpu.vector_store %arg6[%c0_8, %c0_9], %11 {strides = array<i32>} : memref<8x128xf32, #tpu.memory_space<vmem>>, vector<8x128xf32>,
    } else {
    }
    %c0_i32_4 = arith.constant 0 : i32
    %6 = arith.cmpi sgt, %arg2, %c0_i32_4 : i32
    %7 = arith.extui %6 : i1 to i32
    %c0_i32_5 = arith.constant 0 : i32
    %8 = arith.cmpi ne, %7, %c0_i32_5 : i32
    scf.if %8 {
      %c0_6 = arith.constant 0 : index
      %c0_7 = arith.constant 0 : index
      %9 = vector.load %arg6[%c0_6, %c0_7] : memref<8x128xf32, #tpu.memory_space<vmem>>, vector<8x128xf32>
      %10 = arith.addf %9, %2 : vector<8x128xf32>
      %c0_8 = arith.constant 0 : index
      %c0_9 = arith.constant 0 : index
      %11 = vector.load %arg6[%c0_8, %c0_9] : memref<8x128xf32, #tpu.memory_space<vmem>>, vector<8x128xf32>
      tpu.vector_store %arg6[%c0_8, %c0_9], %10 {strides = array<i32>} : memref<8x128xf32, #tpu.memory_space<vmem>>, vector<8x128xf32>,
    } else {
    }
    return
  }
  func.func @transform_0(%arg0: i32, %arg1: i32, %arg2: i32) -> (i32, i32) {
    %c0_i32 = arith.constant 0 : i32
    return %arg0, %arg2 : i32, i32
  }
  func.func @transform_1(%arg0: i32, %arg1: i32, %arg2: i32) -> (i32, i32) {
    %c0_i32 = arith.constant 0 : i32
    return %arg2, %arg1 : i32, i32
  }
  func.func @transform_2(%arg0: i32, %arg1: i32, %arg2: i32) -> (i32, i32) {
    %c0_i32 = arith.constant 0 : i32
    %c0_i32_0 = arith.constant 0 : i32
    return %c0_i32, %arg1 : i32, i32
  }
  func.func @transform_3(%arg0: i32, %arg1: i32, %arg2: i32) -> (i32, i32) {
    %c0_i32 = arith.constant 0 : i32
    return %arg0, %arg1 : i32, i32
  }
}

</mosaic_0001>

<bundles_post_ra>
// kernel: tpu_custom_call.1
= control target key start
LH: loop header
LB: loop body
LE: loop exit
PB: predicated region body
PF: predicated region fallthrough
CT: control target
= control target key end

     0   :  { %8 = vsyncpa [#allocation3], 0  ;;  %s381_s0 = inlined_call_operand.hbm [shape: bf16[8,128], index: 0, kind: input, shape index: {}]   ;;  %s382_s1 = inlined_call_operand.hbm [shape: bf16[128,128], index: 1, kind: input, shape index: {}]   ;;  %s383_s2 = inlined_call_operand.vmem [shape: f32[1,128], index: 2, kind: input, shape index: {}]   ;;  %s384_s3 = inlined_call_operand.hbm [shape: f32[8,128], index: 3, kind: output, shape index: {}]  }
   0x1   :  { %9 = vsyncpa [#allocation6], 0 }
   0x2   :  { %10 = vsyncpa [#allocation4], 0  ;;  %s308_s12 = smov [#allocation2]   ;;  %s309_s14 = smov [#allocation5]  }
   0x3   :  { %s17_s13 = sshll.u32 %s308_s12, 4  ;;  %s26_s15 = sshll.u32 %s309_s14, 4  ;;  %s18_s13 = int_to_ptr.vmem [resolvable:$true] %s17_s13  ;;  %s335_s15 = int_to_ptr.vmem [resolvable:$true] %s26_s15 }
   0x4   :  { %s236_s18 = scalar_lea.hbm %s381_s0, 64 }
   0x5   :  { %p237_p0 = scmp.ne.s32.totalorder %s381_s0, %s236_s18  ;;  %p240_p1 = scmp.lt.u32.totalorder %s236_s18, %s381_s0 }
   0x7   :  { %p242_p2 = pnand %p240_p1, %p237_p0 }
   0x9   :  { %245 = shalt.err (!%p242_p2)
}
   0xa   :  { %s246_s23 = scalar_lea.vmem %s18_s13, 64  ;;  %p251_p4 = scmp.lt.s32.totalorder %s18_s13, %s18_s13 }
   0xb   :  { %p247_p3 = scmp.ne.s32.totalorder %s18_s13, %s246_s23  ;;  %p252_p5 = scmp.lt.s32.totalorder %s246_s23, %s246_s23 }
   0xd   :  { %p253_p6 = por %p252_p5, %p251_p4 }
   0xf   :  { %p254_p7 = pnand %p253_p6, %p247_p3 }
  0x11   :  { %257 = shalt.err (!%p254_p7)
}
  0x12   :  { %20 = dma.hbm_to_vmem [thread:$0]  %s381_s0, 64, %s18_s13, [#allocation3]  }
  0x13   :  { %s258_s28 = scalar_lea.hbm %s382_s1, 1024 }
  0x14   :  { %p259_p8 = scmp.ne.s32.totalorder %s382_s1, %s258_s28  ;;  %p262_p9 = scmp.lt.u32.totalorder %s258_s28, %s382_s1 }
  0x16   :  { %p264_p10 = pnand %p262_p9, %p259_p8 }
  0x18   :  { %267 = shalt.err (!%p264_p10)
}
  0x19   :  { %s268_s6 = scalar_lea.vmem %s335_s15, 1024  ;;  %p273_p12 = scmp.lt.s32.totalorder %s335_s15, %s335_s15 }
  0x1a   :  { %p269_p11 = scmp.ne.s32.totalorder %s335_s15, %s268_s6  ;;  %p274_p13 = scmp.lt.s32.totalorder %s268_s6, %s268_s6 }
  0x1c   :  { %p275_p0 = por %p274_p13, %p273_p12 }
  0x1e   :  { %p276_p1 = pnand %p275_p0, %p269_p11 }
  0x20   :  { %279 = shalt.err (!%p276_p1)
}
  0x21   :  { %s310_s0 = smov 64   ;;  %s311_s7 = smov 4  }
  0x22   :  { %32 = dma.hbm_to_vmem [thread:$0]  %s382_s1, 1024, %s335_s15, [#allocation6], %s310_s0, %s310_s0, %s311_s7  }
  0x23   :  { %302 = dma.done.wait [#allocation3], 64  }
  0x24   :  { %303 = vsyncadd [#allocation3], 4294967232 }
  0x25   :  { %304 = dma.done.wait [#allocation6], 1024  }
  0x26   :  { %305 = vsyncadd [#allocation6], 4294966272  ;;  %v312_v0 = vmov 0.0   ;;  %vm313_vm0 = vmmov 0   ;;  %v228_v1 = vld [vmem:[#allocation5] sm:$0xff]   ;;  %v229_v2 = vld [vmem:[#allocation5 + $0x8] sm:$0xff]  }
  0x27   :  { %201 = vmatprep.subr.bf16.mxu0 %v312_v0  ;;  %217 = vmatprep.mubr.msk.bf16.mxu0 %vm313_vm0, %v312_v0  ;;  %v230_v3 = vld [vmem:[#allocation5 + $0x10] sm:$0xff]   ;;  %v231_v4 = vld [vmem:[#allocation5 + $0x18] sm:$0xff]   ;;  %v232_v5 = vld [vmem:[#allocation5 + $0x20] sm:$0xff]   ;;  %s314_s11 = smov [#allocation7]  }
  0x28   :  { %202 = vmatpush3.bf16.msra.mxu0 %v228_v1  ;;  %v233_v6 = vld [vmem:[#allocation5 + $0x28] sm:$0xff]   ;;  %v234_v7 = vld [vmem:[#allocation5 + $0x30] sm:$0xff]   ;;  %v235_v8 = vld [vmem:[#allocation5 + $0x38] sm:$0xff]   ;;  %s173_s12 = sshll.u32 %s314_s11, 4  ;;  %s174_s12 = int_to_ptr.vmem [resolvable:$true] %s173_s12 }
  0x29   :  { %203 = vmatprep.subr.bf16.mxu0 %v312_v0  ;;  %v42_v9 = vld [vmem:[#allocation2] sm:$0xf]  ;;  %s280_s13 = scalar_lea.vmem %s174_s12, 128  ;;  %p285_p3 = scmp.lt.s32.totalorder %s174_s12, %s174_s12 }
  0x2a   :  { %v191_v10 = vld [vmem:[%s383_s2] ss:$0 sm:$0xff]  ;;  %p281_p2 = scmp.ne.s32.totalorder %s174_s12, %s280_s13  ;;  %p286_p4 = scmp.lt.s32.totalorder %s280_s13, %s280_s13 }
  0x2c   :  { %204 = vmatpush3.bf16.msra.mxu0 %v229_v2  ;;  %p287_p5 = por %p286_p4, %p285_p3 }
  0x2d   :  { %205 = vmatprep.subr.bf16.mxu0 %v312_v0 }
  0x2e   :  { %p288_p6 = pnand %p287_p5, %p281_p2 }
  0x30   :  { %206 = vmatpush3.bf16.msra.mxu0 %v230_v3 }
  0x31   :  { %207 = vmatprep.subr.bf16.mxu0 %v312_v0 }
  0x34   :  { %208 = vmatpush3.bf16.msra.mxu0 %v231_v4 }
  0x35   :  { %209 = vmatprep.subr.bf16.mxu0 %v312_v0 }
  0x38   :  { %210 = vmatpush3.bf16.msra.mxu0 %v232_v5 }
  0x39   :  { %211 = vmatprep.subr.bf16.mxu0 %v312_v0 }
  0x3c   :  { %212 = vmatpush3.bf16.msra.mxu0 %v233_v6 }
  0x3d   :  { %213 = vmatprep.subr.bf16.mxu0 %v312_v0 }
  0x40   :  { %214 = vmatpush3.bf16.msra.mxu0 %v234_v7 }
  0x41   :  { %215 = vmatprep.subr.bf16.mxu0 %v312_v0 }
  0x44   :  { %216 = vmatpush3.bf16.msra.mxu0 %v235_v8 }
  0x47   :  { %218 = vmatmul.mubr.bf16.vlgmr.msra.gmra.mrb[0].mxu0 %v42_v9 }
 0x11a   :  { %v141_v11 = vpop.f32.mrb[0].mxu0 }
 0x11b   :  { %v158_v12 = vadd.f32 %v191_v10, %v141_v11  ;;  %v219_v13 = vpop.f32.mrb[1].mxu0 }
 0x11c   :  { %v144_v14 = vpop.f32.mrb[2].mxu0 }
 0x11d   :  { %159 = vst [vmem:[#allocation7] sm:$0xff] %v158_v12  ;;  %v220_v15 = vpop.f32.mrb[3].mxu0 }
 0x11e   :  { %291 = shalt.err (!%p288_p6)
}
 0x11f   :  { %s292_s2 = scalar_lea.hbm %s384_s3, 128 }
 0x120   :  { %p293_p7 = scmp.ne.s32.totalorder %s384_s3, %s292_s2  ;;  %p296_p8 = scmp.lt.u32.totalorder %s292_s2, %s384_s3 }
 0x122   :  { %p298_p9 = pnand %p296_p8, %p293_p7 }
 0x124   :  { %301 = shalt.err (!%p298_p9)
}
 0x125   :  { %176 = dma.vmem_to_hbm [thread:$0]  %s174_s12, 128, %s384_s3, [#allocation4]  }
 0x126   :  { %306 = dma.done.wait [#allocation4], 128  }
 0x127   :  { %307 = vsyncadd [#allocation4], 4294967168 }
 0x128   :  { %180 = vsyncpa [#allocation3], 1 }
 0x129   :  { %181 = vsyncpa [#allocation6], 1 }
 0x12a   :  { %182 = vsyncpa [#allocation4], 1 }

</bundles_post_ra>
